<compile_context>
chip_gen: v6e
topology: v6e:2x2x1
jax: 0.10.0
libtpu: 0.0.40
codegen_flags: <defaults>
</compile_context>

<pallas_src>
import functools

import jax
import jax.numpy as jnp
from jax.experimental import pallas as pl
from jax.experimental.pallas import tpu as pltpu

LANE = 128          # TPU lane width
H1_PAD = 256        # 200 -> 256
H2_PAD = 128        # 100 -> 128


def _round_up(x, m):
    return ((x + m - 1) // m) * m


def _leaky_relu(x, negative_slope=0.01):
    # F.leaky_relu default negative_slope = 0.01 (computed in f32 on the VPU)
    return jnp.where(x > 0, x, negative_slope * x)


def actor_kernel(x_ref, w1_ref, b1_ref, w2_ref, b2_ref, w3_ref, b3_ref,
                 o_ref, *, max_action):
    x = x_ref[...]  # [TB, state_dim] bf16 (cast once in the wrapper)

    # Layer 1: bf16 operands on the MXU, f32 accumulation, f32 elementwise.
    h1 = jnp.dot(x, w1_ref[...], preferred_element_type=jnp.float32) + b1_ref[...]
    h1 = _leaky_relu(h1)

    # Layer 2
    h2 = jnp.dot(h1.astype(jnp.bfloat16), w2_ref[...],
                 preferred_element_type=jnp.float32) + b2_ref[...]
    h2 = _leaky_relu(h2)

    # Layer 3 + tanh (EUP) + scale; lane-dense [TB, 128] bf16 store.
    h3 = jnp.dot(h2.astype(jnp.bfloat16), w3_ref[...],
                 preferred_element_type=jnp.float32) + b3_ref[...]
    o_ref[...] = (jnp.tanh(h3) * max_action).astype(o_ref.dtype)


def actor_forward(state, params, max_action, *, batch_tile=4096):
    """state: [B, state_dim] f32. params: padded/bf16 weights from init_actor_params.

    Returns f32 [B, action_dim] actions.
    """
    w1, b1 = params["w1"], params["b1"]   # [S, 256] bf16, [1, 256] f32
    w2, b2 = params["w2"], params["b2"]   # [256, 128] bf16, [1, 128] f32
    w3, b3 = params["w3"], params["b3"]   # [128, A_pad] bf16, [1, A_pad] f32
    action_dim = params["action_dim"]

    B, S = state.shape
    a_pad = w3.shape[1]

    # Batch tiling:
    #  * tb <= batch_tile (default 4096 — big enough that per-step pipeline
    #    overhead is amortized; VMEM use at 4096 is only a few MB).
    #  * For B >= 16 cap tb at ceil(B/2) (rounded to 16 for bf16 sublane
    #    packing) so grid >= 2 steps and the "parallel" batch axis can shard
    #    across v7x's two TensorCores.
    #  * Tiny batches get a single full-array block (block dim == array dim).
    if B >= 16:
        tb = min(batch_tile, _round_up((B + 1) // 2, 16))
    else:
        tb = _round_up(B, 8)
    tb = max(tb, 8)
    b_pad = _round_up(B, tb)

    # Input streamed in bf16: halves DMA bytes, layer-1 dot was bf16 anyway.
    state_bf16 = state.astype(jnp.bfloat16)
    if b_pad != B:
        state_bf16 = jnp.pad(state_bf16, ((0, b_pad - B), (0, 0)))
    grid = (b_pad // tb,)

    # Weights/biases use constant index_maps -> stay VMEM-resident across steps.
    resident = lambda shp: pl.BlockSpec(shp, lambda i: (0, 0))

    kernel = functools.partial(actor_kernel, max_action=float(max_action))

    # Advisory cost for XLA's scheduler around the custom call.
    flops = 2 * b_pad * (S * H1_PAD + H1_PAD * H2_PAD + H2_PAD * a_pad)
    weight_bytes = 2 * (S * H1_PAD + H1_PAD * H2_PAD + H2_PAD * a_pad) \
        + 4 * (H1_PAD + H2_PAD + a_pad)
    bytes_accessed = b_pad * (2 * S + 2 * a_pad) + weight_bytes
    cost = pl.CostEstimate(flops=int(flops),
                           transcendentals=int(b_pad * a_pad),
                           bytes_accessed=int(bytes_accessed))

    # TODO(synk): sweep a narrow (tb, action_dim) output slab (legal since the
    # block last dim equals the full array dim) — masked stores but 16-32x less
    # output writeback; keep the lane-dense 128-wide bf16 path as the default.
    out_padded = pl.pallas_call(
        kernel,
        out_shape=jax.ShapeDtypeStruct((b_pad, a_pad), jnp.bfloat16),
        grid=grid,
        in_specs=[
            pl.BlockSpec((tb, S), lambda i: (i, 0)),   # streamed per batch tile
            resident(w1.shape), resident(b1.shape),
            resident(w2.shape), resident(b2.shape),
            resident(w3.shape), resident(b3.shape),
        ],
        out_specs=pl.BlockSpec((tb, a_pad), lambda i: (i, 0)),
        compiler_params=pltpu.CompilerParams(
            dimension_semantics=("parallel",)),
        cost_estimate=cost,
    )(state_bf16, w1, b1, w2, b2, w3, b3)

    return out_padded[:B, :action_dim].astype(jnp.float32)


def init_actor_params(key, state_dim, action_dim):
    """PyTorch-Linear-style init (U[-1/sqrt(fan_in), +]) with zero padding to
    lane-aligned shapes; weights stored pre-transposed [in, out] in bf16,
    biases in f32.  Padded rows/cols are zeros, so they are numerically inert;
    any external parameter update must preserve those zero pads."""
    a_pad = _round_up(action_dim, LANE)

    def linear(key, fan_in, fan_out, in_pad, out_pad):
        kw, kb = jax.random.split(key)
        bound = 1.0 / (fan_in ** 0.5)
        w = jax.random.uniform(kw, (fan_in, fan_out), jnp.float32, -bound, bound)
        b = jax.random.uniform(kb, (1, fan_out), jnp.float32, -bound, bound)
        w = jnp.pad(w, ((0, in_pad - fan_in), (0, out_pad - fan_out)))
        b = jnp.pad(b, ((0, 0), (0, out_pad - fan_out)))
        return w.astype(jnp.bfloat16), b  # bf16 weights, f32 biases

    k1, k2, k3 = jax.random.split(key, 3)
    w1, b1 = linear(k1, state_dim, 200, state_dim, H1_PAD)
    w2, b2 = linear(k2, 200, 100, H1_PAD, H2_PAD)
    w3, b3 = linear(k3, 100, action_dim, H2_PAD, a_pad)
    return {"w1": w1, "b1": b1, "w2": w2, "b2": b2, "w3": w3, "b3": b3,
            "action_dim": action_dim}


def actor_reference(state, params, max_action):
    """Pure-JAX reference emulating the kernel's bf16-operand / f32-accumulate
    math and the final bf16 store.  (A true f32 PyTorch Actor differs by ~1e-2
    relative due to the bf16 weights — acceptable for RL actions.)"""
    def bdot(x, w):
        return jnp.dot(x.astype(jnp.bfloat16).astype(jnp.float32),
                       w.astype(jnp.float32))
    h = _leaky_relu(bdot(state, params["w1"]) + params["b1"])
    h = _leaky_relu(bdot(h, params["w2"]) + params["b2"])
    out = jnp.tanh(bdot(h, params["w3"]) + params["b3"]) * max_action
    out = out.astype(jnp.bfloat16).astype(jnp.float32)
    return out[:, :params["action_dim"]]


if __name__ == "__main__":
    state_dim = 16
    action_dim = 4
    max_action = 2.0
    batch = 8

    key = jax.random.PRNGKey(0)
    k_params, k_state = jax.random.split(key)

    params = init_actor_params(k_params, state_dim, action_dim)
    state = jax.random.normal(k_state, (batch, state_dim), jnp.float32)

    out = actor_forward(state, params, max_action)
    out = jax.block_until_ready(out)

    ref = actor_reference(state, params, max_action)
    assert out.shape == (batch, action_dim)
    assert jnp.allclose(out, ref, atol=1e-2, rtol=1e-2), "mismatch vs reference"

    print("KERNEL_OK")
</pallas_src>

<mosaic_0001>
module attributes {stable_mosaic.version = 11 : i64} {
  func.func @actor_kernel(%arg0: i32, %arg1: memref<8x16xbf16, #tpu.memory_space<vmem>>, %arg2: memref<16x256xbf16, #tpu.memory_space<vmem>>, %arg3: memref<1x256xf32, #tpu.memory_space<vmem>>, %arg4: memref<256x128xbf16, #tpu.memory_space<vmem>>, %arg5: memref<1x128xf32, #tpu.memory_space<vmem>>, %arg6: memref<128x128xbf16, #tpu.memory_space<vmem>>, %arg7: memref<1x128xf32, #tpu.memory_space<vmem>>, %arg8: memref<8x128xbf16, #tpu.memory_space<vmem>>) attributes {dimension_semantics = [#tpu.dimension_semantics<parallel>], iteration_bounds = array<i64: 1>, scalar_prefetch = 0 : i64, scratch_operands = 0 : i64, tpu.core_type = #tpu.core_type<tc>, window_params = [{transform_indices = @transform_0, window_bounds = array<i64: 8, 16>}, {pipeline_mode = #tpu.pipeline_mode<synchronous>, transform_indices = @transform_1, window_bounds = array<i64: 16, 256>}, {pipeline_mode = #tpu.pipeline_mode<synchronous>, transform_indices = @transform_2, window_bounds = array<i64: 1, 256>}, {pipeline_mode = #tpu.pipeline_mode<synchronous>, transform_indices = @transform_3, window_bounds = array<i64: 256, 128>}, {pipeline_mode = #tpu.pipeline_mode<synchronous>, transform_indices = @transform_4, window_bounds = array<i64: 1, 128>}, {pipeline_mode = #tpu.pipeline_mode<synchronous>, transform_indices = @transform_5, window_bounds = array<i64: 128, 128>}, {pipeline_mode = #tpu.pipeline_mode<synchronous>, transform_indices = @transform_6, window_bounds = array<i64: 1, 128>}, {transform_indices = @transform_7, window_bounds = array<i64: 8, 128>}]} {
    %c0 = arith.constant 0 : index
    %c0_0 = arith.constant 0 : index
    %0 = vector.load %arg1[%c0, %c0_0] : memref<8x16xbf16, #tpu.memory_space<vmem>>, vector<8x16xbf16>
    %c0_1 = arith.constant 0 : index
    %c0_2 = arith.constant 0 : index
    %1 = vector.load %arg2[%c0_1, %c0_2] : memref<16x256xbf16, #tpu.memory_space<vmem>>, vector<16x256xbf16>
    %cst = arith.constant dense<0.000000e+00> : vector<8x256xf32>
    %2 = tpu.matmul %0, %1, %cst {dimension_numbers = #tpu.dot_dimension_numbers<[1], [0], [0], [1], [0, 0, 1, 1], [], []>} : vector<8x16xbf16>, vector<16x256xbf16>, vector<8x256xf32> -> vector<8x256xf32>
    %c0_3 = arith.constant 0 : index
    %c0_4 = arith.constant 0 : index
    %3 = vector.load %arg3[%c0_3, %c0_4] : memref<1x256xf32, #tpu.memory_space<vmem>>, vector<1x256xf32>
    %4 = vector.broadcast %3 : vector<1x256xf32> to vector<8x256xf32>
    %5 = arith.addf %2, %4 : vector<8x256xf32>
    %cst_5 = arith.constant 0.000000e+00 : f32
    %6 = vector.broadcast %cst_5 : f32 to vector<8x256xf32>
    %7 = arith.cmpf ogt, %5, %6 : vector<8x256xf32>
    %cst_6 = arith.constant 0.00999999977 : f32
    %8 = vector.broadcast %cst_6 : f32 to vector<8x256xf32>
    %9 = arith.mulf %8, %5 : vector<8x256xf32>
    %10 = arith.select %7, %5, %9 : vector<8x256xi1>, vector<8x256xf32>
    %11 = arith.truncf %10 : vector<8x256xf32> to vector<8x256xbf16>
    %c0_7 = arith.constant 0 : index
    %c0_8 = arith.constant 0 : index
    %12 = vector.load %arg4[%c0_7, %c0_8] : memref<256x128xbf16, #tpu.memory_space<vmem>>, vector<256x128xbf16>
    %cst_9 = arith.constant dense<0.000000e+00> : vector<8x128xf32>
    %13 = tpu.matmul %11, %12, %cst_9 {dimension_numbers = #tpu.dot_dimension_numbers<[1], [0], [0], [1], [0, 0, 1, 1], [], []>} : vector<8x256xbf16>, vector<256x128xbf16>, vector<8x128xf32> -> vector<8x128xf32>
    %c0_10 = arith.constant 0 : index
    %c0_11 = arith.constant 0 : index
    %14 = vector.load %arg5[%c0_10, %c0_11] : memref<1x128xf32, #tpu.memory_space<vmem>>, vector<1x128xf32>
    %15 = vector.broadcast %14 : vector<1x128xf32> to vector<8x128xf32>
    %16 = arith.addf %13, %15 : vector<8x128xf32>
    %cst_12 = arith.constant 0.000000e+00 : f32
    %17 = vector.broadcast %cst_12 : f32 to vector<8x128xf32>
    %18 = arith.cmpf ogt, %16, %17 : vector<8x128xf32>
    %cst_13 = arith.constant 0.00999999977 : f32
    %19 = vector.broadcast %cst_13 : f32 to vector<8x128xf32>
    %20 = arith.mulf %19, %16 : vector<8x128xf32>
    %21 = arith.select %18, %16, %20 : vector<8x128xi1>, vector<8x128xf32>
    %22 = arith.truncf %21 : vector<8x128xf32> to vector<8x128xbf16>
    %c0_14 = arith.constant 0 : index
    %c0_15 = arith.constant 0 : index
    %23 = vector.load %arg6[%c0_14, %c0_15] : memref<128x128xbf16, #tpu.memory_space<vmem>>, vector<128x128xbf16>
    %cst_16 = arith.constant dense<0.000000e+00> : vector<8x128xf32>
    %24 = tpu.matmul %22, %23, %cst_16 {dimension_numbers = #tpu.dot_dimension_numbers<[1], [0], [0], [1], [0, 0, 1, 1], [], []>} : vector<8x128xbf16>, vector<128x128xbf16>, vector<8x128xf32> -> vector<8x128xf32>
    %c0_17 = arith.constant 0 : index
    %c0_18 = arith.constant 0 : index
    %25 = vector.load %arg7[%c0_17, %c0_18] : memref<1x128xf32, #tpu.memory_space<vmem>>, vector<1x128xf32>
    %26 = vector.broadcast %25 : vector<1x128xf32> to vector<8x128xf32>
    %27 = arith.addf %24, %26 : vector<8x128xf32>
    %28 = math.tanh %27 : vector<8x128xf32>
    %cst_19 = arith.constant 2.000000e+00 : f32
    %29 = vector.broadcast %cst_19 : f32 to vector<8x128xf32>
    %30 = arith.mulf %28, %29 : vector<8x128xf32>
    %31 = arith.truncf %30 : vector<8x128xf32> to vector<8x128xbf16>
    %c0_20 = arith.constant 0 : index
    %c0_21 = arith.constant 0 : index
    %32 = vector.load %arg8[%c0_20, %c0_21] : memref<8x128xbf16, #tpu.memory_space<vmem>>, vector<8x128xbf16>
    tpu.vector_store %arg8[%c0_20, %c0_21], %31 {strides = array<i32>} : memref<8x128xbf16, #tpu.memory_space<vmem>>, vector<8x128xbf16>,
    return
  }
  func.func @transform_0(%arg0: i32) -> (i32, i32) {
    %c0_i32 = arith.constant 0 : i32
    %c0_i32_0 = arith.constant 0 : i32
    return %arg0, %c0_i32 : i32, i32
  }
  func.func @transform_1(%arg0: i32) -> (i32, i32) {
    %c0_i32 = arith.constant 0 : i32
    %c0_i32_0 = arith.constant 0 : i32
    %c0_i32_1 = arith.constant 0 : i32
    return %c0_i32, %c0_i32_0 : i32, i32
  }
  func.func @transform_2(%arg0: i32) -> (i32, i32) {
    %c0_i32 = arith.constant 0 : i32
    %c0_i32_0 = arith.constant 0 : i32
    %c0_i32_1 = arith.constant 0 : i32
    return %c0_i32, %c0_i32_0 : i32, i32
  }
  func.func @transform_3(%arg0: i32) -> (i32, i32) {
    %c0_i32 = arith.constant 0 : i32
    %c0_i32_0 = arith.constant 0 : i32
    %c0_i32_1 = arith.constant 0 : i32
    return %c0_i32, %c0_i32_0 : i32, i32
  }
  func.func @transform_4(%arg0: i32) -> (i32, i32) {
    %c0_i32 = arith.constant 0 : i32
    %c0_i32_0 = arith.constant 0 : i32
    %c0_i32_1 = arith.constant 0 : i32
    return %c0_i32, %c0_i32_0 : i32, i32
  }
  func.func @transform_5(%arg0: i32) -> (i32, i32) {
    %c0_i32 = arith.constant 0 : i32
    %c0_i32_0 = arith.constant 0 : i32
    %c0_i32_1 = arith.constant 0 : i32
    return %c0_i32, %c0_i32_0 : i32, i32
  }
  func.func @transform_6(%arg0: i32) -> (i32, i32) {
    %c0_i32 = arith.constant 0 : i32
    %c0_i32_0 = arith.constant 0 : i32
    %c0_i32_1 = arith.constant 0 : i32
    return %c0_i32, %c0_i32_0 : i32, i32
  }
  func.func @transform_7(%arg0: i32) -> (i32, i32) {
    %c0_i32 = arith.constant 0 : i32
    %c0_i32_0 = arith.constant 0 : i32
    return %arg0, %c0_i32 : i32, i32
  }
}

</mosaic_0001>

<bundles_post_ra>
// kernel: tpu_custom_call.1
= control target key start
LH: loop header
LB: loop body
LE: loop exit
PB: predicated region body
PF: predicated region fallthrough
CT: control target
= control target key end

     0   :  { %12 = vsyncpa [#allocation3], 0  ;;  %s775_s0 = inlined_call_operand.hbm [shape: bf16[8,16], index: 0, kind: input, shape index: {}]   ;;  %s776_s1 = inlined_call_operand.hbm [shape: bf16[16,256], index: 1, kind: input, shape index: {}]   ;;  %s777_s2 = inlined_call_operand.vmem [shape: f32[1,256], index: 2, kind: input, shape index: {}]   ;;  %s778_s3 = inlined_call_operand.hbm [shape: bf16[256,128], index: 3, kind: input, shape index: {}]   ;;  %s779_s4 = inlined_call_operand.vmem [shape: f32[1,128], index: 4, kind: input, shape index: {}]   ;;  %s780_s5 = inlined_call_operand.hbm [shape: bf16[128,128], index: 5, kind: input, shape index: {}]   ;;  %s781_s6 = inlined_call_operand.vmem [shape: f32[1,128], index: 6, kind: input, shape index: {}]   ;;  %s782_s7 = inlined_call_operand.hbm [shape: bf16[8,128], index: 7, kind: output, shape index: {}]  }
   0x1   :  { %13 = vsyncpa [#allocation6], 0 }
   0x2   :  { %14 = vsyncpa [#allocation9], 0 }
   0x3   :  { %15 = vsyncpa [#allocation4], 0  ;;  %s699_s24 = smov [#allocation5]  }
   0x4   :  { %s31_s25 = sshll.u32 %s699_s24, 4  ;;  %s32_s25 = int_to_ptr.vmem [resolvable:$true] %s31_s25 }
   0x5   :  { %s599_s26 = scalar_lea.vmem %s32_s25, 256  ;;  %p604_p1 = scmp.lt.s32.totalorder %s32_s25, %s32_s25 }
   0x6   :  { %p600_p0 = scmp.ne.s32.totalorder %s32_s25, %s599_s26  ;;  %p605_p2 = scmp.lt.s32.totalorder %s599_s26, %s599_s26 }
   0x8   :  { %p606_p3 = por %p605_p2, %p604_p1 }
   0xa   :  { %p607_p4 = pnand %p606_p3, %p600_p0 }
   0xc   :  { %610 = shalt.err (!%p607_p4)
}
   0xd   :  { %s700_s27 = smov 128   ;;  %s701_s28 = smov 8  }
   0xe   :  { %37 = dma.hbm_to_vmem [thread:$0]  %s776_s1, 256, %s32_s25, [#allocation6], %s700_s27, %s700_s27, %s701_s28  }
   0xf   :  { %s702_s8 = smov [#allocation2]   ;;  %s703_s10 = smov [#allocation7]  }
  0x10   :  { %s22_s9 = sshll.u32 %s702_s8, 4  ;;  %s45_s11 = sshll.u32 %s703_s10, 4  ;;  %s23_s9 = int_to_ptr.vmem [resolvable:$true] %s22_s9  ;;  %s46_s11 = int_to_ptr.vmem [resolvable:$true] %s45_s11 }
  0x11   :  { %s619_s12 = scalar_lea.vmem %s23_s9, 64  ;;  %p624_p6 = scmp.lt.s32.totalorder %s23_s9, %s23_s9 }
  0x12   :  { %p620_p5 = scmp.ne.s32.totalorder %s23_s9, %s619_s12  ;;  %p625_p7 = scmp.lt.s32.totalorder %s619_s12, %s619_s12 }
  0x14   :  { %p626_p8 = por %p625_p7, %p624_p6 }
  0x16   :  { %p627_p9 = pnand %p626_p8, %p620_p5 }
  0x18   :  { %630 = shalt.err (!%p627_p9)
}
  0x19   :  { %25 = dma.hbm_to_vmem [thread:$0]  %s775_s0, 64, %s23_s9, [#allocation3]  }
  0x1a   :  { %s639_s15 = scalar_lea.vmem %s46_s11, 2048  ;;  %p644_p11 = scmp.lt.s32.totalorder %s46_s11, %s46_s11 }
  0x1b   :  { %p640_p10 = scmp.ne.s32.totalorder %s46_s11, %s639_s15  ;;  %p645_p12 = scmp.lt.s32.totalorder %s639_s15, %s639_s15 }
  0x1d   :  { %p646_p13 = por %p645_p12, %p644_p11 }
  0x1f   :  { %p647_p0 = pnand %p646_p13, %p640_p10 }
  0x21   :  { %650 = shalt.err (!%p647_p0)
}
  0x22   :  { %s704_s1 = smov 64   ;;  %s705_s16 = smov 4  }
  0x23   :  { %51 = dma.hbm_to_vmem [thread:$0]  %s778_s3, 2048, %s46_s11, [#allocation6], %s704_s1, %s704_s1, %s705_s16  }
  0x24   :  { %s706_s19 = smov [#allocation8]  }
  0x25   :  { %s59_s20 = sshll.u32 %s706_s19, 4  ;;  %s60_s20 = int_to_ptr.vmem [resolvable:$true] %s59_s20 }
  0x26   :  { %s659_s21 = scalar_lea.vmem %s60_s20, 1024  ;;  %p664_p2 = scmp.lt.s32.totalorder %s60_s20, %s60_s20 }
  0x27   :  { %p660_p1 = scmp.ne.s32.totalorder %s60_s20, %s659_s21  ;;  %p665_p3 = scmp.lt.s32.totalorder %s659_s21, %s659_s21 }
  0x29   :  { %p666_p4 = por %p665_p3, %p664_p2 }
  0x2b   :  { %p667_p5 = pnand %p666_p4, %p660_p1 }
  0x2d   :  { %670 = shalt.err (!%p667_p5)
}
  0x2e   :  { %65 = dma.hbm_to_vmem [thread:$0]  %s780_s5, 1024, %s60_s20, [#allocation9], %s704_s1, %s704_s1, %s705_s16  }
  0x2f   :  { %691 = dma.done.wait [#allocation3], 64  }
  0x30   :  { %692 = vsyncadd [#allocation3], 4294967232 }
  0x31   :  { %693 = dma.done.wait [#allocation6], 2304  }
  0x32   :  { %694 = vsyncadd [#allocation6], 4294964992 }
  0x33   :  { %695 = dma.done.wait [#allocation9], 1024  }
  0x34   :  { %696 = vsyncadd [#allocation9], 4294966272  ;;  %v707_v0 = vmov 0   ;;  %v562_v1 = vld [vmem:[#allocation5 + $0x4] ss:$8 sps:$4 sm:$0xff]   ;;  %vm106_vm0 = vcmask 130048   ;;  %v86_v26 = vlaneseq }
  0x35   :  { %142 = vmatprep.mubr.bf16.mxu0 %v707_v0  ;;  %v564_v2 = vld [vmem:[#allocation5] ss:$8 sps:$4 sm:$0xff]   ;;  %v81_v3 = vld [vmem:[#allocation2] sm:$0xf]  ;;  %124 = vmatprep.subr.bf16.mxu0 %v562_v1  ;;  %v571_v10 = vld [vmem:[#allocation7 + $0x60] sm:$0xff]   ;;  %v708_v21 = vmov 0.0  }
  0x36   :  { %v565_v4 = vld [vmem:[#allocation7 + $0x78] sm:$0xff]   ;;  %125 = vmatpush1.bf16.msra.mxu0 %v564_v2  ;;  %v567_v6 = vld [vmem:[#allocation7 + $0x70] sm:$0xff]   ;;  %v569_v8 = vld [vmem:[#allocation7 + $0x68] sm:$0xff]   ;;  %v87_v27 = vshrl.u32 %v86_v26, 7  ;;  %vm709_vm3 = vmmov 0  }
  0x37   :  { %v566_v5 = vld [vmem:[#allocation7 + $0x38] sm:$0xff]   ;;  %499 = vmatprep.subr.bf16.mxu1 %v565_v4  ;;  %v568_v7 = vld [vmem:[#allocation7 + $0x30] sm:$0xff]   ;;  %v570_v9 = vld [vmem:[#allocation7 + $0x28] sm:$0xff]   ;;  %530 = vmatprep.subr.bf16.mxu0 %v708_v21 }
  0x38   :  { %500 = vmatpush3.bf16.msra.mxu1 %v566_v5  ;;  %v572_v11 = vld [vmem:[#allocation7 + $0x20] sm:$0xff]   ;;  %v573_v12 = vld [vmem:[#allocation7 + $0x58] sm:$0xff]   ;;  %v575_v14 = vld [vmem:[#allocation7 + $0x50] sm:$0xff]   ;;  %v88_v28 = vsub.s32 0, %v87_v27  ;;  %v92_v30 = vsub.s32 1, %v87_v27 }
  0x39   :  { %472 = vmatmul.mubr.msk.bf16.vlgmr.msra.gmra.mxu0 %vm106_vm0, %v81_v3  ;;  %501 = vmatprep.subr.bf16.mxu1 %v567_v6  ;;  %v574_v13 = vld [vmem:[#allocation7 + $0x18] sm:$0xff]   ;;  %v576_v15 = vld [vmem:[#allocation7 + $0x10] sm:$0xff]   ;;  %v577_v16 = vld [vmem:[#allocation7 + $0x48] sm:$0xff]  }
  0x3a   :  { %v578_v17 = vld [vmem:[#allocation7 + $0x8] sm:$0xff]   ;;  %v579_v18 = vld [vmem:[#allocation7 + $0x40] sm:$0xff]   ;;  %v581_v20 = vld [vmem:[#allocation8 + $0x38] sm:$0xff]   ;;  %546 = vmatprep.mubr.msk.bf16.mxu0 %vm709_vm3, %v708_v21 }
  0x3b   :  { %v580_v19 = vld [vmem:[#allocation7] sm:$0xff]   ;;  %531 = vmatpush3.bf16.msra.mxu0 %v581_v20  ;;  %v582_v22 = vld [vmem:[#allocation8 + $0x30] sm:$0xff]   ;;  %v583_v23 = vld [vmem:[#allocation8 + $0x28] sm:$0xff]  }
  0x3c   :  { %502 = vmatpush3.bf16.msra.mxu1 %v568_v7  ;;  %532 = vmatprep.subr.bf16.mxu0 %v708_v21  ;;  %v584_v24 = vld [vmem:[#allocation8 + $0x20] sm:$0xff]   ;;  %v585_v25 = vld [vmem:[#allocation8 + $0x18] sm:$0xff]   ;;  %v84_v29 = vld [vmem:[%s777_s2] sm:$0x3] }
  0x3d   :  { %503 = vmatprep.subr.bf16.mxu1 %v569_v8  ;;  %v89_v31 = vrot.slane %v84_v29, %v88_v28  ;;  %v93_v32 = vrot.slane %v84_v29, %v92_v30  ;;  %v586_v45 = vld [vmem:[#allocation8 + $0x10] sm:$0xff]   ;;  %v587_v46 = vld [vmem:[#allocation8 + $0x8] sm:$0xff]   ;;  %v588_v47 = vld [vmem:[#allocation8] sm:$0xff]  }
  0x3e   :  { %v473_v49 = vld [vmem:[%s779_s4] ss:$0 sm:$0xff]  ;;  %s710_s4 = smov [#allocation10]  }
  0x3f   :  { %533 = vmatpush3.bf16.msra.mxu0 %v582_v22  ;;  %v490_v58 = vld [vmem:[%s781_s6] ss:$0 sm:$0xff]  ;;  %s459_s26 = sshll.u32 %s710_s4, 4  ;;  %s460_s26 = int_to_ptr.vmem [resolvable:$true] %s459_s26 }
  0x40   :  { %504 = vmatpush3.bf16.msra.mxu1 %v570_v9  ;;  %534 = vmatprep.subr.bf16.mxu0 %v708_v21  ;;  %s671_s27 = scalar_lea.vmem %s460_s26, 64  ;;  %p676_p7 = scmp.lt.s32.totalorder %s460_s26, %s460_s26 }
  0x41   :  { %505 = vmatprep.subr.bf16.mxu1 %v571_v10  ;;  %p672_p6 = scmp.ne.s32.totalorder %s460_s26, %s671_s27  ;;  %p677_p8 = scmp.lt.s32.totalorder %s671_s27, %s671_s27 }
  0x43   :  { %535 = vmatpush3.bf16.msra.mxu0 %v583_v23  ;;  %p678_p9 = por %p677_p8, %p676_p7 }
  0x44   :  { %506 = vmatpush3.bf16.msra.mxu1 %v572_v11  ;;  %536 = vmatprep.subr.bf16.mxu0 %v708_v21 }
  0x45   :  { %507 = vmatprep.subr.bf16.mxu1 %v573_v12  ;;  %p679_p10 = pnand %p678_p9, %p672_p6 }
  0x47   :  { %537 = vmatpush3.bf16.msra.mxu0 %v584_v24 }
  0x48   :  { %508 = vmatpush3.bf16.msra.mxu1 %v574_v13  ;;  %538 = vmatprep.subr.bf16.mxu0 %v708_v21 }
  0x49   :  { %509 = vmatprep.subr.bf16.mxu1 %v575_v14 }
  0x4b   :  { %539 = vmatpush3.bf16.msra.mxu0 %v585_v25 }
  0x4c   :  { %510 = vmatpush3.bf16.msra.mxu1 %v576_v15  ;;  %540 = vmatprep.subr.bf16.mxu0 %v708_v21 }
  0x4d   :  { %511 = vmatprep.subr.bf16.mxu1 %v577_v16 }
  0x4f   :  { %541 = vmatpush3.bf16.msra.mxu0 %v586_v45 }
  0x50   :  { %512 = vmatpush3.bf16.msra.mxu1 %v578_v17  ;;  %542 = vmatprep.subr.bf16.mxu0 %v708_v21 }
  0x51   :  { %513 = vmatprep.subr.bf16.mxu1 %v579_v18 }
  0x53   :  { %543 = vmatpush3.bf16.msra.mxu0 %v587_v46 }
  0x54   :  { %514 = vmatpush3.bf16.msra.mxu1 %v580_v19  ;;  %544 = vmatprep.subr.bf16.mxu0 %v708_v21 }
  0x57   :  { %545 = vmatpush3.bf16.msra.mxu0 %v588_v47 }
  0xf9   :  { %v144_v33 = vpop.f32.mrf.mxu0 }
  0xfa   :  { %v145_v34 = vadd.f32 %v144_v33, %v89_v31 }
  0xfb   :  { %v146_v35 = vpop.f32.mrf.mxu0 }
  0xfc   :  { %vm151_vm1 = vcmp.gt.f32.partialorder %v145_v34, 0.0  ;;  %v153_v36 = vmul.f32 0.01, %v145_v34  ;;  %v147_v37 = vadd.f32 %v146_v35, %v93_v32 }
  0xfd   :  { %v148_v38 = vpop.f32.mrf.mxu0 }
  0xfe   :  { %vm152_vm2 = vcmp.gt.f32.partialorder %v147_v37, 0.0  ;;  %v154_v39 = vmul.f32 0.01, %v147_v37  ;;  %v155_v41 = vsel %vm151_vm1, %v145_v34, %v153_v36 }
  0xff   :  { %v149_v40 = vpop.f32.mrf.mxu0  ;;  %v157_v44 = vpack.c.bf16 %v155_v41, %v155_v41 }
 0x100   :  { %v156_v42 = vsel %vm152_vm2, %v147_v37, %v154_v39 }
 0x101   :  { %v158_v43 = vpack.c.bf16 %v156_v42, %v156_v42 }
 0x103   :  { %326 = vmatprep.mubr.bf16.mxu1 %v158_v43 }
 0x104   :  { %327 = vmatmul.mubr.bf16.vlgmr.msra.gmra.mxu1 %v157_v44 }
 0x1c4   :  { %v515_v48 = vpop.f32.mrf.mxu1 }
 0x1c6   :  { %v516_v50 = vpop.f32.mrf.mxu1 }
 0x1c7   :  { %v517_v51 = vadd.f32 %v516_v50, %v515_v48 }
 0x1c8   :  { %v518_v52 = vpop.f32.mrf.mxu1 }
 0x1c9   :  { %v329_v53 = vadd.f32 %v517_v51, %v473_v49 }
 0x1ca   :  { %v519_v54 = vpop.f32.mrf.mxu1 }
 0x1cb   :  { %vm334_vm4 = vcmp.gt.f32.partialorder %v329_v53, 0.0  ;;  %v335_v55 = vmul.f32 0.01, %v329_v53 }
 0x1cd   :  { %v336_v56 = vsel %vm334_vm4, %v329_v53, %v335_v55 }
 0x1ce   :  { %v337_v57 = vpack.c.bf16 %v336_v56, %v336_v56 }
 0x1d0   :  { %547 = vmatmul.mubr.bf16.vlgmr.msra.gmra.mxu0 %v337_v57 }
 0x290   :  { %v443_v59 = vpop.f32.mrf.mxu0 }
 0x291   :  { %v444_v60 = vadd.f32 %v490_v58, %v443_v59 }
 0x292   :  { %v548_v61 = vpop.f32.mrf.mxu0 }
 0x293   :  { %589 = vtanh.f32 %v444_v60 }
 0x294   :  { %v446_v62 = vpop.f32.mrf.mxu0 }
 0x296   :  { %v549_v63 = vpop.f32.mrf.mxu0 }
 0x2a0   :  { %v590_v0 = vpop.eup %589 }
 0x2a1   :  { %v450_v1 = vmul.f32 2.0, %v590_v0 }
 0x2a3   :  { %v451_v2 = vpack.c.bf16 %v450_v1, %v450_v1 }
 0x2a5   :  { %452 = vst [vmem:[#allocation10] sm:$0xf] %v451_v2 }
 0x2a6   :  { %682 = shalt.err (!%p679_p10)
}
 0x2a7   :  { %462 = dma.vmem_to_hbm [thread:$0]  %s460_s26, 64, %s782_s7, [#allocation4]  }
 0x2a8   :  { %697 = dma.done.wait [#allocation4], 64  }
 0x2a9   :  { %698 = vsyncadd [#allocation4], 4294967232 }
 0x2aa   :  { %466 = vsyncpa [#allocation3], 1 }
 0x2ab   :  { %467 = vsyncpa [#allocation6], 1 }
 0x2ac   :  { %468 = vsyncpa [#allocation9], 1 }
 0x2ad   :  { %469 = vsyncpa [#allocation4], 1 }

</bundles_post_ra>
